<compile_context>
chip_gen: v5e
topology: v5e:2x2
jax: 0.10.0
libtpu: 0.0.40
codegen_flags: <defaults>
</compile_context>

<pallas_src>
import math
from functools import partial

import jax
import jax.numpy as jnp
from jax.experimental import pallas as pl
from jax.experimental.pallas import tpu as pltpu


def _round_up(x: int, m: int) -> int:
    return ((x + m - 1) // m) * m


def _cdiv(a: int, b: int) -> int:
    return (a + b - 1) // b


def _pose_embed_kernel(x_ref, w_ref, b_ref, o_ref, *, b_tile, n_out):
    """One (batch-tile, seq-tile) block of the pose embedding.

    x_ref: (b_tile, ts, K)      input rows (natural layout)
    w_ref: (K, N)               resident weight (constant index_map)
    b_ref: (1, N)               resident bias
    o_ref: (ts, b_tile*N)       permuted output block
    """
    w = w_ref[...]
    bias = b_ref[...].astype(jnp.float32)
    for bi in range(b_tile):  # static unroll: amortizes per-step overhead
        acc = jnp.dot(x_ref[bi], w, preferred_element_type=jnp.float32)
        o_ref[:, bi * n_out:(bi + 1) * n_out] = (acc + bias).astype(o_ref.dtype)


def input_process_forward(x, w, b, *, max_seq_tile=512):
    """Replicates InputProcess.forward.

    x: (bs, seq, input_feats)
    w: (input_feats, latent_dim)   (transpose of torch's (out, in) weight)
    b: (latent_dim,)
    returns: (seq, bs, latent_dim)
    """
    bs, seq, in_feats = x.shape
    K, N = w.shape
    assert K == in_feats, "weight fan-in must match input_feats"
    out_dtype = x.dtype

    # Only cast the tiny resident weight when activations already arrive in
    # bf16 (never cast the big x stream in the wrapper: extra HBM round trip).
    if x.dtype == jnp.bfloat16 and w.dtype != jnp.bfloat16:
        w = w.astype(jnp.bfloat16)
    b2d = b.reshape(1, N).astype(jnp.float32)

    # --- batch tile: B_TILE*N lane-dense (multiple of 128) when possible -----
    b_req = 1 if N % 128 == 0 else 128 // math.gcd(N, 128)
    if b_req >= bs:
        b_tile = bs  # block spans the full bs*N output width (always legal)
    else:
        b_tile = min(_round_up(8, b_req), (bs // b_req) * b_req)
        b_tile = max(b_tile, b_req)

    # --- balanced seq tiles: multiple of 8, or the full (possibly ragged) seq -
    if seq <= 8:
        ts = seq
    else:
        n_tiles = _cdiv(seq, max_seq_tile)
        ts = _round_up(_cdiv(seq, n_tiles), 8)
        if ts >= seq:
            ts = seq

    # --- VMEM budget: 75% of physical capacity; shrink tiles to fit ----------
    x_item = jnp.dtype(x.dtype).itemsize
    w_item = jnp.dtype(w.dtype).itemsize
    o_item = jnp.dtype(out_dtype).itemsize
    try:
        vmem_cap = int(pltpu.get_tpu_info().vmem_capacity_bytes)
    except Exception:
        vmem_cap = 64 * 1024 * 1024  # conservative (v7x per-TC)
    budget = (3 * vmem_cap) // 4

    def need(ts_, bt_):
        # double-buffered x / out tiles + (double-buffered) resident w / bias
        return (2 * bt_ * ts_ * K * x_item
                + 2 * ts_ * bt_ * N * o_item
                + 2 * (K * N * w_item + N * 4))

    while need(ts, b_tile) > budget:
        if ts > 8:
            ts = max(8, _round_up(ts // 2, 8))
        elif b_tile > b_req and b_tile > 1:
            b_tile = max(b_req, _round_up(b_tile // 2, b_req))
        else:
            break

    n_b = _cdiv(bs, b_tile)
    n_seq = _cdiv(seq, ts)

    # v7x has 2 TensorCores: don't collapse a long sequence into one step.
    if n_b * n_seq == 1 and seq >= 256:
        ts = max(8, _round_up(_cdiv(seq, 2), 8))
        n_seq = _cdiv(seq, ts)

    vmem_limit = int(min(budget, max(2 * need(ts, b_tile), 32 * 1024 * 1024)))

    cost = pl.CostEstimate(
        flops=2 * bs * seq * K * N,
        transcendentals=0,
        bytes_accessed=(bs * seq * K * x_item + K * N * w_item + N * 4
                        + seq * bs * N * o_item),
    )

    kernel = partial(_pose_embed_kernel, b_tile=b_tile, n_out=N)

    out2d = pl.pallas_call(
        kernel,
        out_shape=jax.ShapeDtypeStruct((seq, bs * N), out_dtype),
        grid_spec=pltpu.PrefetchScalarGridSpec(
            num_scalar_prefetch=0,
            grid=(n_b, n_seq),
            in_specs=[
                # x read in natural (bs, seq, K) layout: block (b_tile, ts, K)
                pl.BlockSpec((b_tile, ts, K), lambda bi, si: (bi, si, 0)),
                # weight / bias resident in VMEM (constant block index)
                pl.BlockSpec((K, N), lambda bi, si: (0, 0)),
                pl.BlockSpec((1, N), lambda bi, si: (0, 0)),
            ],
            # permute fused here: (seq-tile si, batch-tile bi) of (seq, bs*N)
            out_specs=pl.BlockSpec((ts, b_tile * N), lambda bi, si: (si, bi)),
        ),
        compiler_params=pltpu.CompilerParams(
            dimension_semantics=("parallel", "parallel"),
            vmem_limit_bytes=vmem_limit,
        ),
        cost_estimate=cost,
    )(x, w, b2d)

    # Contiguous split of the last dim -> free reshape, no slice, no copy.
    return out2d.reshape(seq, bs, N)


if __name__ == "__main__":
    key = jax.random.PRNGKey(0)

    def make_case(k, bs, seq, input_feats, latent_dim):
        kx, kw, kb = jax.random.split(k, 3)
        x = jax.random.normal(kx, (bs, seq, input_feats), dtype=jnp.float32)
        bound = 1.0 / math.sqrt(input_feats)
        w = jax.random.uniform(kw, (input_feats, latent_dim), dtype=jnp.float32,
                               minval=-bound, maxval=bound)
        b = jax.random.uniform(kb, (latent_dim,), dtype=jnp.float32,
                               minval=-bound, maxval=bound)
        return x, w, b

    def reference(x, w, b):
        return jnp.transpose(x, (1, 0, 2)) @ w + b

    # Case 1: small shapes consistent with the module (bs=2, seq=8, 64 -> 32).
    x, w, b = make_case(key, bs=2, seq=8, input_feats=64, latent_dim=32)
    y = jax.block_until_ready(input_process_forward(x, w, b))
    y_ref = reference(x, w, b)
    assert y.shape == (8, 2, 32)
    assert jnp.allclose(y, y_ref, atol=1e-5, rtol=1e-5)

    # Case 2: ragged seq / awkward dims exercise full-width blocks + masking.
    k2 = jax.random.fold_in(key, 1)
    x2, w2, b2 = make_case(k2, bs=3, seq=13, input_feats=48, latent_dim=20)
    y2 = jax.block_until_ready(input_process_forward(x2, w2, b2))
    y2_ref = reference(x2, w2, b2)
    assert y2.shape == (13, 3, 20)
    assert jnp.allclose(y2, y2_ref, atol=1e-5, rtol=1e-5)

    # Case 3: bf16 activations supplied by the caller (weight cast is in-wrapper,
    # x streamed as-is; f32 MXU accumulation) -> loose tolerance.
    y3 = jax.block_until_ready(input_process_forward(x.astype(jnp.bfloat16), w, b))
    assert y3.shape == (8, 2, 32)
    assert jnp.allclose(y3.astype(jnp.float32), y_ref, atol=1e-1, rtol=1e-1)

    print("KERNEL_OK")
</pallas_src>

<mosaic_0001>
module attributes {stable_mosaic.version = 11 : i64} {
  func.func @_pose_embed_kernel(%arg0: i32, %arg1: i32, %arg2: memref<2x8x64xf32, #tpu.memory_space<vmem>>, %arg3: memref<64x32xf32, #tpu.memory_space<vmem>>, %arg4: memref<1x32xf32, #tpu.memory_space<vmem>>, %arg5: memref<8x64xf32, #tpu.memory_space<vmem>>) attributes {dimension_semantics = [#tpu.dimension_semantics<parallel>, #tpu.dimension_semantics<parallel>], iteration_bounds = array<i64: 1, 1>, scalar_prefetch = 0 : i64, scratch_operands = 0 : i64, tpu.core_type = #tpu.core_type<tc>, window_params = [{transform_indices = @transform_0, window_bounds = array<i64: 2, 8, 64>}, {pipeline_mode = #tpu.pipeline_mode<synchronous>, transform_indices = @transform_1, window_bounds = array<i64: 64, 32>}, {pipeline_mode = #tpu.pipeline_mode<synchronous>, transform_indices = @transform_2, window_bounds = array<i64: 1, 32>}, {transform_indices = @transform_3, window_bounds = array<i64: 8, 64>}]} {
    %c0 = arith.constant 0 : index
    %c0_0 = arith.constant 0 : index
    %0 = vector.load %arg3[%c0, %c0_0] : memref<64x32xf32, #tpu.memory_space<vmem>>, vector<64x32xf32>
    %c0_1 = arith.constant 0 : index
    %c0_2 = arith.constant 0 : index
    %1 = vector.load %arg4[%c0_1, %c0_2] : memref<1x32xf32, #tpu.memory_space<vmem>>, vector<1x32xf32>
    %c0_3 = arith.constant 0 : index
    %c0_4 = arith.constant 0 : index
    %c0_5 = arith.constant 0 : index
    %2 = vector.load %arg2[%c0_3, %c0_4, %c0_5] : memref<2x8x64xf32, #tpu.memory_space<vmem>>, vector<1x8x64xf32>
    %3 = vector.shape_cast %2 : vector<1x8x64xf32> to vector<8x64xf32>
    %cst = arith.constant dense<0.000000e+00> : vector<8x32xf32>
    %4 = tpu.matmul %3, %0, %cst {dimension_numbers = #tpu.dot_dimension_numbers<[1], [0], [0], [1], [0, 0, 1, 1], [], []>} : vector<8x64xf32>, vector<64x32xf32>, vector<8x32xf32> -> vector<8x32xf32>
    %5 = vector.broadcast %1 : vector<1x32xf32> to vector<8x32xf32>
    %6 = arith.addf %4, %5 : vector<8x32xf32>
    %c0_6 = arith.constant 0 : index
    %c0_7 = arith.constant 0 : index
    %7 = vector.load %arg5[%c0_6, %c0_7] : memref<8x64xf32, #tpu.memory_space<vmem>>, vector<8x32xf32>
    tpu.vector_store %arg5[%c0_6, %c0_7], %6 {strides = array<i32>} : memref<8x64xf32, #tpu.memory_space<vmem>>, vector<8x32xf32>,
    %c1 = arith.constant 1 : index
    %c0_8 = arith.constant 0 : index
    %c0_9 = arith.constant 0 : index
    %8 = vector.load %arg2[%c1, %c0_8, %c0_9] : memref<2x8x64xf32, #tpu.memory_space<vmem>>, vector<1x8x64xf32>
    %9 = vector.shape_cast %8 : vector<1x8x64xf32> to vector<8x64xf32>
    %cst_10 = arith.constant dense<0.000000e+00> : vector<8x32xf32>
    %10 = tpu.matmul %9, %0, %cst_10 {dimension_numbers = #tpu.dot_dimension_numbers<[1], [0], [0], [1], [0, 0, 1, 1], [], []>} : vector<8x64xf32>, vector<64x32xf32>, vector<8x32xf32> -> vector<8x32xf32>
    %11 = vector.broadcast %1 : vector<1x32xf32> to vector<8x32xf32>
    %12 = arith.addf %10, %11 : vector<8x32xf32>
    %c0_11 = arith.constant 0 : index
    %c32 = arith.constant 32 : index
    %13 = vector.load %arg5[%c0_11, %c32] : memref<8x64xf32, #tpu.memory_space<vmem>>, vector<8x32xf32>
    tpu.vector_store %arg5[%c0_11, %c32], %12 {strides = array<i32>} : memref<8x64xf32, #tpu.memory_space<vmem>>, vector<8x32xf32>,
    return
  }
  func.func @transform_0(%arg0: i32, %arg1: i32) -> (i32, i32, i32) {
    %c0_i32 = arith.constant 0 : i32
    %c0_i32_0 = arith.constant 0 : i32
    return %arg0, %arg1, %c0_i32 : i32, i32, i32
  }
  func.func @transform_1(%arg0: i32, %arg1: i32) -> (i32, i32) {
    %c0_i32 = arith.constant 0 : i32
    %c0_i32_0 = arith.constant 0 : i32
    %c0_i32_1 = arith.constant 0 : i32
    return %c0_i32, %c0_i32_0 : i32, i32
  }
  func.func @transform_2(%arg0: i32, %arg1: i32) -> (i32, i32) {
    %c0_i32 = arith.constant 0 : i32
    %c0_i32_0 = arith.constant 0 : i32
    %c0_i32_1 = arith.constant 0 : i32
    return %c0_i32, %c0_i32_0 : i32, i32
  }
  func.func @transform_3(%arg0: i32, %arg1: i32) -> (i32, i32) {
    %c0_i32 = arith.constant 0 : i32
    return %arg1, %arg0 : i32, i32
  }
}

</mosaic_0001>

<bundles_post_ra>
// kernel: tpu_custom_call.1
= control target key start
LH: loop header
LB: loop body
LE: loop exit
PB: predicated region body
PF: predicated region fallthrough
CT: control target
= control target key end

     0   :  { %s191_s0 = inlined_call_operand.vmem [shape: f32[2,8,64], index: 0, kind: input, shape index: {}]   ;;  %s192_s1 = inlined_call_operand.vmem [shape: f32[64,32], index: 1, kind: input, shape index: {}]   ;;  %s193_s2 = inlined_call_operand.vmem [shape: f32[1,32], index: 2, kind: input, shape index: {}]   ;;  %s194_s3 = inlined_call_operand.hbm [shape: f32[8,64], index: 3, kind: output, shape index: {}]  }
   0x1   :  { %v22_v0 = vld [vmem:[%s192_s1 + $0x38] sm:$0xff]  ;;  %v21_v1 = vld [vmem:[%s192_s1 + $0x30] sm:$0xff]  ;;  %v20_v2 = vld [vmem:[%s192_s1 + $0x28] sm:$0xff] }
   0x2   :  { %67 = vmatpush.msra.mxu1 %v22_v0  ;;  %40 = vmatpush.msra.mxu0 %v22_v0  ;;  %v19_v3 = vld [vmem:[%s192_s1 + $0x20] sm:$0xff] }
   0x4   :  { %68 = vmatpush.msra.mxu1 %v21_v1  ;;  %41 = vmatpush.msra.mxu0 %v21_v1 }
   0x5   :  { %8 = vsyncpa [#allocation3], 0  ;;  %v18_v4 = vld [vmem:[%s192_s1 + $0x18] sm:$0xff]  ;;  %v17_v5 = vld [vmem:[%s192_s1 + $0x10] sm:$0xff]  ;;  %vm28_vm0 = vcmask 523264   ;;  %vm52_vm1 = vcmask 261120  }
   0x6   :  { %69 = vmatpush.msra.mxu1 %v20_v2  ;;  %42 = vmatpush.msra.mxu0 %v20_v2  ;;  %v16_v6 = vld [vmem:[%s192_s1 + $0x8] sm:$0xff]  ;;  %v15_v7 = vld [vmem:[%s192_s1] sm:$0xff]  ;;  %s133_s1 = smov 32   ;;  %s134_s7 = smov [#allocation2]   ;;  %vm83_vm2 = vcmask 523520  }
   0x7   :  { %v102_v8 = vld [vmem:[%s191_s0 + $0x8] sm:$0xff]  ;;  %v24_v9 = vld [vmem:[%s191_s0] sm:$0xff]  ;;  %s90_s8 = sshll.u32 %s134_s7, 4  ;;  %s92_s10 = sshll.u32 %s194_s3, 4  ;;  %s91_s8 = int_to_ptr.vmem [resolvable:$true] %s90_s8  ;;  %s93_s10 = int_to_ptr.hbm [resolvable:$true] %s92_s10 }
   0x8   :  { %70 = vmatpush.msra.mxu1 %v19_v3  ;;  %43 = vmatpush.msra.mxu0 %v19_v3  ;;  %v106_v10 = vld [vmem:[%s193_s2] ss:$0 sm:$0xff] }
   0xa   :  { %71 = vmatpush.msra.mxu1 %v18_v4  ;;  %44 = vmatpush.msra.mxu0 %v18_v4 }
   0xc   :  { %72 = vmatpush.msra.mxu1 %v17_v5  ;;  %45 = vmatpush.msra.mxu0 %v17_v5 }
   0xe   :  { %73 = vmatpush.msra.mxu1 %v16_v6  ;;  %46 = vmatpush.msra.mxu0 %v16_v6 }
  0x10   :  { %74 = vmatpush.msra.mxu1 %v15_v7  ;;  %47 = vmatpush.msra.mxu0 %v15_v7 }
  0x11   :  { %103 = vmatmul.msk.f32.vlgmr.msra.gmra.mxu1 %vm28_vm0, %v102_v8  ;;  %101 = vmatmul.msk.f32.vlgmr.msra.gmra.mxu0 %vm28_vm0, %v24_v9 }
  0x8e   :  { %v76_v11 = vpop.f32.mrf.mxu1  ;;  %v49_v12 = vpop.f32.mrf.mxu0 }
  0x8f   :  { %v77_v13 = vadd.f32 %v106_v10, %v76_v11  ;;  %v50_v14 = vadd.f32 %v106_v10, %v49_v12 }
  0x91   :  { %80 = vrot.lane.b32.xlu0 %v77_v13, %s133_s1  ;;  %53 = vst.msk [vmem:[#allocation2] sm:$0xff] %vm52_vm1, %v50_v14 }
 0x103   :  { %v81_v15 = vpop.permute.xlu0 %80 }
 0x104   :  { %84 = vst.msk [vmem:[#allocation2] sm:$0xff] %vm83_vm2, %v81_v15 }
 0x105   :  { %95 = dma.vmem_to_hbm [thread:$0]  %s91_s8, 128, %s93_s10, [#allocation3]  }
 0x106   :  { %131 = dma.done.wait [#allocation3], 128  }
 0x107   :  { %132 = vsyncadd [#allocation3], 4294967168 }
 0x108   :  { %100 = vsyncpa [#allocation3], 1 }

</bundles_post_ra>
